<compile_context>
chip_gen: v6e
topology: v6e:2x2x1
jax: 0.10.0
libtpu: 0.0.40
codegen_flags: <defaults>
</compile_context>

<pallas_src>
import functools

import jax
import jax.numpy as jnp
from jax.experimental import pallas as pl
from jax.experimental.pallas import tpu as pltpu


def _interaction_kernel(c_ref,       # [Bt, N, basis]        f32
                        d_ref,       # [Bt, N, N, hidden]    f32 or bf16
                        m_ref,       # [Bt, N, 1]            f32 (1.0 valid / 0.0 padded atom)
                        wcf_t_ref,   # [basis, hidden]       f32  (cf.weight.T)
                        bcf_ref,     # [1, hidden]           f32  (cf.bias)
                        wfc_t_ref,   # [hidden, basis_pad]   f32/bf16 (fc.weight.T, zero-padded cols)
                        o_ref,       # [Bt, N, basis_pad]    f32
                        *, Bt, N, basis, hidden, basis_pad):
    # cf(C) for all Bt molecules in one MXU matmul: [Bt*N, basis] @ [basis, hidden]
    C2 = c_ref[...].reshape(Bt * N, basis)
    X1 = jnp.dot(C2, wcf_t_ref[...], preferred_element_type=jnp.float32) + bcf_ref[...]
    X1 = X1.reshape(Bt, N, hidden)

    # Factored row mask (i < size): zero the invalid atoms' features.  Exact
    # because fc has no bias, so tanh(fc(0)) == 0 contributes nothing to the
    # i-reduction below.  (Replaces the old (N, N, basis) mask multiply.)
    X1 = X1 * m_ref[...]                       # [Bt, N, 1] broadcast over hidden
    X1 = X1.astype(d_ref.dtype)

    # Pair features: broadcast over j and modulate by D_hat -> [Bt, N, N, hidden]  (VPU)
    Y = X1[:, :, None, :] * d_ref[...]

    # fc + tanh: one big MXU matmul over all (molecule, i, j) rows; lane-dense output.
    Z = jnp.tanh(
        jnp.dot(Y.reshape(Bt * N * N, hidden), wfc_t_ref[...],
                preferred_element_type=jnp.float32))

    # Reduce over i (torch .sum(-3)); row mask already folded into X1.
    out = jnp.sum(Z.reshape(Bt, N, N, basis_pad), axis=1)   # [Bt, N(j), basis_pad]

    # Factored column mask (j < size), then store.
    o_ref[...] = (out * m_ref[...]).astype(o_ref.dtype)


def interaction_block(C, D_hat, sizes, Wcf, bcf, Wfc, *,
                      compute_dtype=jnp.float32,
                      vmem_budget_bytes=16 * 1024 * 1024):
    """Pallas forward of InteractionBlock.

    C      : [B, N, basis]      float32
    D_hat  : [B, N, N, hidden]  float32
    sizes  : [B] int32 (num valid atoms per molecule, <= N == MAX_ATOMS)
    Wcf    : [hidden, basis]    (cf.weight, PyTorch layout)
    bcf    : [hidden]           (cf.bias)
    Wfc    : [basis, hidden]    (fc.weight, PyTorch layout, no bias)
    compute_dtype: dtype used for D_hat / the pair product / the fc matmul.
                   jnp.bfloat16 roughly halves HBM traffic (D_hat dominates).
    returns: [B, N, basis] float32
    """
    B, N, basis = C.shape
    hidden = Wcf.shape[0]
    basis_pad = ((basis + 127) // 128) * 128   # lane-dense output width

    # --- glue: weights / masks in kernel-friendly layout ---------------------
    wcf_t = jnp.asarray(Wcf, jnp.float32).T                               # [basis, hidden]
    bcf2 = jnp.asarray(bcf, jnp.float32).reshape(1, hidden)               # [1, hidden]
    wfc_t = (jnp.zeros((hidden, basis_pad), jnp.float32)
             .at[:, :basis].set(jnp.asarray(Wfc, jnp.float32).T)
             .astype(compute_dtype))                                      # [hidden, basis_pad]

    C = jnp.asarray(C, jnp.float32)
    D = jnp.asarray(D_hat, compute_dtype)
    sizes = jnp.asarray(sizes, jnp.int32)

    # Per-atom validity vector; mask_2d(sizes)[b,i,j] factors as valid[b,i]*valid[b,j].
    valid = (jnp.arange(N)[None, :] < sizes[:, None]).astype(jnp.float32)  # [B, N]
    valid = valid[:, :, None]                                              # [B, N, 1]

    # --- pick molecules-per-step (Bt) from a VMEM budget ----------------------
    db = jnp.dtype(compute_dtype).itemsize
    per_mol = (3 * N * N * hidden * db        # D_hat block (x2 double-buffered) + Y
               + N * N * basis_pad * 4        # Z
               + 2 * N * basis_pad * 4        # out block (double-buffered)
               + 2 * N * basis * 4            # C block (double-buffered)
               + 2 * N * hidden * 4)          # X1 + slack
    bt = max(1, vmem_budget_bytes // per_mol)
    if B >= 2:
        bt = min(bt, (B + 1) // 2)            # keep >= 2 grid steps (v7x: 2 TCs/chip)
    bt = int(min(bt, B))
    # TODO(synk): for very large N (a single molecule's D_hat block over budget),
    #             additionally tile the j axis on a second "parallel" grid dim and
    #             chunk the i-reduction with a fori_loop accumulator.

    num_steps = -(-B // bt)
    B_pad = num_steps * bt
    if B_pad != B:
        pad = B_pad - B
        C = jnp.pad(C, ((0, pad), (0, 0), (0, 0)))
        D = jnp.pad(D, ((0, pad), (0, 0), (0, 0), (0, 0)))
        valid = jnp.pad(valid, ((0, pad), (0, 0), (0, 0)))   # padded mols -> mask 0 -> output 0

    grid_spec = pltpu.PrefetchScalarGridSpec(
        num_scalar_prefetch=0,
        grid=(num_steps,),
        in_specs=[
            pl.BlockSpec((bt, N, basis), lambda g: (g, 0, 0)),
            pl.BlockSpec((bt, N, N, hidden), lambda g: (g, 0, 0, 0)),
            pl.BlockSpec((bt, N, 1), lambda g: (g, 0, 0)),
            pl.BlockSpec((basis, hidden), lambda g: (0, 0)),
            pl.BlockSpec((1, hidden), lambda g: (0, 0)),
            pl.BlockSpec((hidden, basis_pad), lambda g: (0, 0)),
        ],
        out_specs=pl.BlockSpec((bt, N, basis_pad), lambda g: (g, 0, 0)),
    )

    cost = pl.CostEstimate(
        flops=2 * B * N * N * hidden * basis_pad + 2 * B * N * basis * hidden,
        transcendentals=B * N * N * basis_pad,
        bytes_accessed=(B * N * N * hidden * db            # D_hat (dominant stream)
                        + B * N * basis * 4                # C
                        + B * N * 4                        # valid mask
                        + B * N * basis_pad * 4            # output
                        + (basis + basis_pad + 1) * hidden * 4),
    )

    out = pl.pallas_call(
        functools.partial(_interaction_kernel, Bt=bt, N=N, basis=basis,
                          hidden=hidden, basis_pad=basis_pad),
        out_shape=jax.ShapeDtypeStruct((B_pad, N, basis_pad), jnp.float32),
        grid_spec=grid_spec,
        compiler_params=pltpu.CompilerParams(
            dimension_semantics=("parallel",),
            vmem_limit_bytes=40 * 1024 * 1024),
        cost_estimate=cost,
    )(C, D, valid, wcf_t, bcf2, wfc_t)

    return out[:B, :, :basis]


def interaction_block_ref(C, D_hat, sizes, Wcf, bcf, Wfc):
    """Pure-JAX reference matching the PyTorch forward."""
    N = C.shape[1]
    X = C @ Wcf.T + bcf                           # [B, N, hidden]
    X = X[:, :, None, :] * D_hat                  # [B, N, N, hidden]
    X = jnp.tanh(X @ Wfc.T)                       # [B, N, N, basis]
    idx = jnp.arange(N)
    mask = jnp.logical_and(idx[None, :, None] < sizes[:, None, None],
                           idx[None, None, :] < sizes[:, None, None]).astype(X.dtype)
    return (mask[..., None] * X).sum(-3)          # [B, N, basis]


if __name__ == "__main__":
    B, MAX_ATOMS, BASIS, HIDDEN = 2, 8, 16, 32

    key = jax.random.PRNGKey(0)
    k_c, k_d, k_wcf, k_bcf, k_wfc = jax.random.split(key, 5)

    C = jax.random.normal(k_c, (B, MAX_ATOMS, BASIS), jnp.float32)
    D_hat = jax.random.normal(k_d, (B, MAX_ATOMS, MAX_ATOMS, HIDDEN), jnp.float32)
    sizes = jnp.array([5, 8], dtype=jnp.int32)

    # deterministic synthetic params (nn.Linear shapes)
    Wcf = jax.random.normal(k_wcf, (HIDDEN, BASIS), jnp.float32) * 0.1   # cf.weight
    bcf = jax.random.normal(k_bcf, (HIDDEN,), jnp.float32) * 0.1         # cf.bias
    Wfc = jax.random.normal(k_wfc, (BASIS, HIDDEN), jnp.float32) * 0.1   # fc.weight

    out = interaction_block(C, D_hat, sizes, Wcf, bcf, Wfc)  # f32 path: exact semantics
    out = jax.block_until_ready(out)

    ref = interaction_block_ref(C, D_hat, sizes, Wcf, bcf, Wfc)
    assert out.shape == (B, MAX_ATOMS, BASIS)
    assert jnp.allclose(out, ref, atol=1e-5, rtol=1e-5), "mismatch vs JAX reference"

    print("KERNEL_OK")
</pallas_src>

<mosaic_0001>
module attributes {stable_mosaic.version = 11 : i64} {
  func.func @_interaction_kernel(%arg0: i32, %arg1: memref<1x8x16xf32, #tpu.memory_space<vmem>>, %arg2: memref<1x8x8x32xf32, #tpu.memory_space<vmem>>, %arg3: memref<1x8x1xf32, #tpu.memory_space<vmem>>, %arg4: memref<16x32xf32, #tpu.memory_space<vmem>>, %arg5: memref<1x32xf32, #tpu.memory_space<vmem>>, %arg6: memref<32x128xf32, #tpu.memory_space<vmem>>, %arg7: memref<1x8x128xf32, #tpu.memory_space<vmem>>) attributes {dimension_semantics = [#tpu.dimension_semantics<parallel>], iteration_bounds = array<i64: 2>, scalar_prefetch = 0 : i64, scratch_operands = 0 : i64, tpu.core_type = #tpu.core_type<tc>, window_params = [{transform_indices = @transform_0, window_bounds = array<i64: 1, 8, 16>}, {transform_indices = @transform_1, window_bounds = array<i64: 1, 8, 8, 32>}, {transform_indices = @transform_2, window_bounds = array<i64: 1, 8, 1>}, {pipeline_mode = #tpu.pipeline_mode<synchronous>, transform_indices = @transform_3, window_bounds = array<i64: 16, 32>}, {pipeline_mode = #tpu.pipeline_mode<synchronous>, transform_indices = @transform_4, window_bounds = array<i64: 1, 32>}, {pipeline_mode = #tpu.pipeline_mode<synchronous>, transform_indices = @transform_5, window_bounds = array<i64: 32, 128>}, {transform_indices = @transform_6, window_bounds = array<i64: 1, 8, 128>}]} {
    %c0 = arith.constant 0 : index
    %c0_0 = arith.constant 0 : index
    %c0_1 = arith.constant 0 : index
    %0 = vector.load %arg1[%c0, %c0_0, %c0_1] : memref<1x8x16xf32, #tpu.memory_space<vmem>>, vector<1x8x16xf32>
    %1 = vector.shape_cast %0 : vector<1x8x16xf32> to vector<8x16xf32>
    %c0_2 = arith.constant 0 : index
    %c0_3 = arith.constant 0 : index
    %2 = vector.load %arg4[%c0_2, %c0_3] : memref<16x32xf32, #tpu.memory_space<vmem>>, vector<16x32xf32>
    %cst = arith.constant dense<0.000000e+00> : vector<8x32xf32>
    %3 = tpu.matmul %1, %2, %cst {dimension_numbers = #tpu.dot_dimension_numbers<[1], [0], [0], [1], [0, 0, 1, 1], [], []>} : vector<8x16xf32>, vector<16x32xf32>, vector<8x32xf32> -> vector<8x32xf32>
    %c0_4 = arith.constant 0 : index
    %c0_5 = arith.constant 0 : index
    %4 = vector.load %arg5[%c0_4, %c0_5] : memref<1x32xf32, #tpu.memory_space<vmem>>, vector<1x32xf32>
    %5 = vector.broadcast %4 : vector<1x32xf32> to vector<8x32xf32>
    %6 = arith.addf %3, %5 : vector<8x32xf32>
    %7 = vector.shape_cast %6 : vector<8x32xf32> to vector<1x8x32xf32>
    %c0_6 = arith.constant 0 : index
    %c0_7 = arith.constant 0 : index
    %c0_8 = arith.constant 0 : index
    %8 = vector.load %arg3[%c0_6, %c0_7, %c0_8] : memref<1x8x1xf32, #tpu.memory_space<vmem>>, vector<1x8x1xf32>
    %9 = vector.broadcast %8 : vector<1x8x1xf32> to vector<1x8x32xf32>
    %10 = arith.mulf %7, %9 : vector<1x8x32xf32>
    %11 = vector.shape_cast %10 : vector<1x8x32xf32> to vector<1x8x1x32xf32>
    %c0_9 = arith.constant 0 : index
    %c0_10 = arith.constant 0 : index
    %c0_11 = arith.constant 0 : index
    %c0_12 = arith.constant 0 : index
    %12 = vector.load %arg2[%c0_9, %c0_10, %c0_11, %c0_12] : memref<1x8x8x32xf32, #tpu.memory_space<vmem>>, vector<1x8x8x32xf32>
    %13 = vector.broadcast %11 : vector<1x8x1x32xf32> to vector<1x8x8x32xf32>
    %14 = arith.mulf %13, %12 : vector<1x8x8x32xf32>
    %15 = vector.shape_cast %14 : vector<1x8x8x32xf32> to vector<64x32xf32>
    %c0_13 = arith.constant 0 : index
    %c0_14 = arith.constant 0 : index
    %16 = vector.load %arg6[%c0_13, %c0_14] : memref<32x128xf32, #tpu.memory_space<vmem>>, vector<32x128xf32>
    %cst_15 = arith.constant dense<0.000000e+00> : vector<64x128xf32>
    %17 = tpu.matmul %15, %16, %cst_15 {dimension_numbers = #tpu.dot_dimension_numbers<[1], [0], [0], [1], [0, 0, 1, 1], [], []>} : vector<64x32xf32>, vector<32x128xf32>, vector<64x128xf32> -> vector<64x128xf32>
    %18 = math.tanh %17 : vector<64x128xf32>
    %19 = vector.shape_cast %18 : vector<64x128xf32> to vector<1x8x8x128xf32>
    %cst_16 = arith.constant dense<0.000000e+00> : vector<1x8x128xf32>
    %20 = vector.multi_reduction <add>, %19, %cst_16 [1] : vector<1x8x8x128xf32> to vector<1x8x128xf32>
    %c0_17 = arith.constant 0 : index
    %c0_18 = arith.constant 0 : index
    %c0_19 = arith.constant 0 : index
    %21 = vector.load %arg3[%c0_17, %c0_18, %c0_19] : memref<1x8x1xf32, #tpu.memory_space<vmem>>, vector<1x8x1xf32>
    %22 = vector.broadcast %21 : vector<1x8x1xf32> to vector<1x8x128xf32>
    %23 = arith.mulf %20, %22 : vector<1x8x128xf32>
    %c0_20 = arith.constant 0 : index
    %c0_21 = arith.constant 0 : index
    %c0_22 = arith.constant 0 : index
    %24 = vector.load %arg7[%c0_20, %c0_21, %c0_22] : memref<1x8x128xf32, #tpu.memory_space<vmem>>, vector<1x8x128xf32>
    tpu.vector_store %arg7[%c0_20, %c0_21, %c0_22], %23 {strides = array<i32>} : memref<1x8x128xf32, #tpu.memory_space<vmem>>, vector<1x8x128xf32>,
    return
  }
  func.func @transform_0(%arg0: i32) -> (i32, i32, i32) {
    %c0_i32 = arith.constant 0 : i32
    %c0_i32_0 = arith.constant 0 : i32
    %c0_i32_1 = arith.constant 0 : i32
    return %arg0, %c0_i32, %c0_i32_0 : i32, i32, i32
  }
  func.func @transform_1(%arg0: i32) -> (i32, i32, i32, i32) {
    %c0_i32 = arith.constant 0 : i32
    %c0_i32_0 = arith.constant 0 : i32
    %c0_i32_1 = arith.constant 0 : i32
    %c0_i32_2 = arith.constant 0 : i32
    return %arg0, %c0_i32, %c0_i32_0, %c0_i32_1 : i32, i32, i32, i32
  }
  func.func @transform_2(%arg0: i32) -> (i32, i32, i32) {
    %c0_i32 = arith.constant 0 : i32
    %c0_i32_0 = arith.constant 0 : i32
    %c0_i32_1 = arith.constant 0 : i32
    return %arg0, %c0_i32, %c0_i32_0 : i32, i32, i32
  }
  func.func @transform_3(%arg0: i32) -> (i32, i32) {
    %c0_i32 = arith.constant 0 : i32
    %c0_i32_0 = arith.constant 0 : i32
    %c0_i32_1 = arith.constant 0 : i32
    return %c0_i32, %c0_i32_0 : i32, i32
  }
  func.func @transform_4(%arg0: i32) -> (i32, i32) {
    %c0_i32 = arith.constant 0 : i32
    %c0_i32_0 = arith.constant 0 : i32
    %c0_i32_1 = arith.constant 0 : i32
    return %c0_i32, %c0_i32_0 : i32, i32
  }
  func.func @transform_5(%arg0: i32) -> (i32, i32) {
    %c0_i32 = arith.constant 0 : i32
    %c0_i32_0 = arith.constant 0 : i32
    %c0_i32_1 = arith.constant 0 : i32
    return %c0_i32, %c0_i32_0 : i32, i32
  }
  func.func @transform_6(%arg0: i32) -> (i32, i32, i32) {
    %c0_i32 = arith.constant 0 : i32
    %c0_i32_0 = arith.constant 0 : i32
    %c0_i32_1 = arith.constant 0 : i32
    return %arg0, %c0_i32, %c0_i32_0 : i32, i32, i32
  }
}

</mosaic_0001>

<bundles_post_ra>
// kernel: tpu_custom_call.1
= control target key start
LH: loop header
LB: loop body
LE: loop exit
PB: predicated region body
PF: predicated region fallthrough
CT: control target
= control target key end

     0   :  { %11 = vsyncpa [#allocation3], 0  ;;  %s1390_s0 = inlined_call_operand.vmem [shape: f32[2,8,16], index: 0, kind: input, shape index: {}]   ;;  %s1391_s1 = inlined_call_operand.hbm [shape: f32[2,8,8,32], index: 1, kind: input, shape index: {}]   ;;  %s1392_s2 = inlined_call_operand.vmem [shape: f32[2,8,1], index: 2, kind: input, shape index: {}]   ;;  %s1393_s3 = inlined_call_operand.hbm [shape: f32[16,32], index: 3, kind: input, shape index: {}]   ;;  %s1394_s4 = inlined_call_operand.vmem [shape: f32[1,32], index: 4, kind: input, shape index: {}]   ;;  %s1395_s5 = inlined_call_operand.hbm [shape: f32[32,128], index: 5, kind: input, shape index: {}]   ;;  %s1396_s6 = inlined_call_operand.hbm [shape: f32[2,8,128], index: 6, kind: output, shape index: {}]  }
   0x1   :  { %13 = vsyncpa [#allocation3 + $0x1], 0 }
   0x2   :  { %14 = vsyncpa [#allocation6], 0 }
   0x3   :  { %15 = vsyncpa [#allocation4], 0 }
   0x4   :  { %17 = vsyncpa [#allocation4 + $0x1], 0  ;;  %s1173_s21 = smov 0   ;;  %s1175_s22 = smov 0  }
   0x5   :  { %s1177_s23 = smov 0   ;;  %s1179_s24 = smov 0  }
   0x6 LB: > { %s1194_s25 = sadd.s32 4294967295, %s1126_s24   ;;  %s808_s26 = sadd.s32 4294967294, %s1126_s24   ;;  %s1126_s24 = sphi %s1179_s24, %s1421_s24   ;;  %s1122_s23 = sphi %s1177_s23, %s1420_s23   ;;  %s1118_s22 = sphi %s1175_s22, %s1419_s22   ;;  %s1114_s21 = sphi %s1173_s21, %s1418_s21  }
   0x7   : > { %p69_p0 = scmp.ne.s32.totalorder %s1118_s22, %s1114_s21  ;;  %p1397_p1 = scmp.eq.s32.totalorder %s1194_s25, 0 }
   0x8   : > { %p182_p2 = scmp.eq.s32.totalorder %s1194_s25, 1  ;;  %p188_p3 = scmp.eq.s32.totalorder %s808_s26, 1 }
   0x9   : > { %p1203_p4 = por %p1397_p1, %p69_p0  ;;  %p809_p5 = scmp.ge.s32.totalorder %s1126_s24, 1 }
   0xa   : > { %p1208_p6 = por %p188_p3, %p69_p0  ;;  %p195_p7 = scmp.lt.s32.totalorder %s1126_s24, 3 }
   0xb   : > { %s1403_s27 = scalar_select %p1203_p4, 1, 0 }
   0xc   : > { %s1404_s28 = scalar_select %p1208_p6, 1, 0 }
   0xd   : > { %p1213_p8 = pnand %p809_p5, %p195_p7  ;;  %s1128_s30 = smov [#allocation5]  }
   0xe   : > { %s207_s7 = sshll.u32 %s1128_s30, 4  ;;  %s1129_s9 = smov [#allocation7]   ;;  %s208_s7 = int_to_ptr.vmem [resolvable:$true] %s207_s7 }
   0xf   : > { %s1405_s29 = scalar_select %p1213_p8, 1, 0 }
  0x10   : > { %p900_p9 = pneg %p1213_p8  ;;  %s223_s10 = sshll.u32 %s1129_s9, 4  ;;  %s224_s10 = int_to_ptr.vmem [resolvable:$true] %s223_s10 }
  0x11   : > { %s989_s11 = scalar_lea.vmem %s208_s7, 256  ;;  %p997_p5 = scmp.lt.s32.totalorder %s208_s7, %s208_s7 }
  0x12   : > { %p1222_p11 = pnand %p900_p9, %p1397_p1  ;;  %p990_p13 = scmp.ne.s32.totalorder %s208_s7, %s989_s11 }
  0x13   : > { %p998_p7 = scmp.lt.s32.totalorder %s989_s11, %s989_s11 }
  0x14   : > { %p980_p12 = pneg %p1222_p11 }
  0x15   : > { %p999_p10 = por %p998_p7, %p997_p5 }
  0x16   : > { %p992_p0 = pnand %p990_p13, %p980_p12 }
  0x18   : > { %p993_p3 = pneg %p992_p0 }
  0x1a   : > { %p1000_p9 = pnand %p999_p10, %p993_p3 }
  0x1c   : > { %1003 = shalt.err (!%p1000_p9)
}
  0x1d   : > { %s1398_s12 = smov 128   ;;  %s1399_s13 = smov 8  }
  0x1e   : > { %903 = dma.hbm_to_vmem [thread:$0]  (!%p1222_p11), %s1393_s3, 256, %s208_s7, [#allocation6], %s1398_s12, %s1398_s12, %s1399_s13  }
  0x1f   : > { %s1015_s16 = scalar_lea.vmem %s224_s10, 512  ;;  %p1023_p10 = scmp.lt.s32.totalorder %s224_s10, %s224_s10 }
  0x20   : > { %p1016_p13 = scmp.ne.s32.totalorder %s224_s10, %s1015_s16  ;;  %p1024_p3 = scmp.lt.s32.totalorder %s1015_s16, %s1015_s16 }
  0x22   : > { %p1018_p0 = pnand %p1016_p13, %p980_p12  ;;  %p1025_p7 = por %p1024_p3, %p1023_p10 }
  0x24   : > { %p1019_p5 = pneg %p1018_p0 }
  0x26   : > { %p1026_p9 = pnand %p1025_p7, %p1019_p5 }
  0x28   : > { %1029 = shalt.err (!%p1026_p9)
}
  0x29   : > { %906 = dma.hbm_to_vmem [thread:$0]  (!%p1222_p11), %s1395_s5, 512, %s224_s10, [#allocation6], %s1398_s12, %s1398_s12, %s1399_s13  }
  0x2a   : > { %s1251_s19 = sadd.s32 1, %s1126_s24   ;;  %s56_s20 = sadd.s32 1, %s1122_s23 }
  0x2b   : > { %s53_s26 = ssub.s32 %s1126_s24, %s1251_s19  ;;  %p63_p12 = scmp.ne.s32.totalorder %s1122_s23, %s1118_s22 }
  0x2c   : > { %p54_p13 = scmp.eq.s32.totalorder %s53_s26, 0  ;;  %p64_p0 = scmp.eq.s32.totalorder %s1126_s24, 0 }
  0x2d   : > { %p1261_p5 = por %p182_p2, %p63_p12  ;;  %p917_p10 = scmp.lt.s32.totalorder %s1126_s24, 2 }
  0x2e   : > { %s1267_s7 = scalar_select %p54_p13, %s1122_s23, %s56_s20  }
  0x2f   : > { %s1407_s30 = scalar_select %p1261_p5, 1, 0 }
  0x30   : > { %p65_p3 = por %p64_p0, %p63_p12  ;;  %s244_s8 = sand.u32 1, %s1122_s23  }
  0x31   : > { %s813_s9 = sshll.u32 %s244_s8, 6  ;;  %s837_s10 = sshll.u32 %s1126_s24, 10 }
  0x32   : > { %s1274_s15 = scalar_lea.hbm %s1391_s1, %s837_s10  ;;  %s248_s16 = scalar_lea.vmem [#allocation2], %s813_s9 }
  0x33   : > { %s255_s17 = sshll.u32 %s248_s16, 4  ;;  %p1278_p2 = pnand %p917_p10, %p65_p3  ;;  %s1276_s17 = int_to_ptr.vmem [resolvable:$true] %s255_s17 }
  0x34   : > { %s1282_s20 = scalar_lea.sflag [#allocation3], %s244_s8  ;;  %s1030_s26 = scalar_lea.hbm %s1274_s15, 1024 }
  0x35   : > { %p1031_p11 = scmp.ne.s32.totalorder %s1274_s15, %s1030_s26  ;;  %p1032_p7 = pneg %p1278_p2 }
  0x36   : > { %s1035_s9 = scalar_lea.hbm %s1391_s1, 2048  ;;  %p1036_p13 = scmp.lt.s32.totalorder %s1274_s15, %s1391_s1 }
  0x37   : > { %p1033_p9 = pnand %p1032_p7, %p1031_p11  ;;  %p1037_p0 = scmp.lt.s32.totalorder %s1035_s9, %s1030_s26 }
  0x39   : > { %p1034_p12 = pneg %p1033_p9  ;;  %p1038_p10 = por %p1037_p0, %p1036_p13 }
  0x3b   : > { %p1039_p3 = pnand %p1038_p10, %p1034_p12 }
  0x3d   : > { %1042 = shalt.err (!%p1039_p3)
}
  0x3e   : > { %s1043_s8 = scalar_lea.vmem %s1276_s17, 1024  ;;  %s1132_s12 = smov [#allocation2]  }
  0x3f   : > { %p1044_p1 = scmp.ne.s32.totalorder %s1276_s17, %s1043_s8  ;;  %s1048_s13 = sshll.u32 %s1132_s12, 4  ;;  %s1049_s13 = int_to_ptr.vmem [resolvable:$false] %s1048_s13 }
  0x40   : > { %s1050_s10 = scalar_lea.vmem %s1049_s13, 2048  ;;  %p1051_p9 = scmp.lt.s32.totalorder %s1276_s17, %s1049_s13 }
  0x41   : > { %p1046_p6 = pnand %p1044_p1, %p1032_p7  ;;  %p1052_p5 = scmp.lt.s32.totalorder %s1050_s10, %s1043_s8 }
  0x43   : > { %p1047_p11 = pneg %p1046_p6  ;;  %p1053_p4 = por %p1052_p5, %p1051_p9 }
  0x45   : > { %p1054_p8 = pnand %p1053_p4, %p1047_p11 }
  0x47   : > { %1057 = shalt.err (!%p1054_p8)
}
  0x48   : > { %s1409_s26 = smov 8   ;;  %s1410_s11 = smov 128  }
  0x49   : > { %910 = dma.hbm_to_vmem [thread:$0]  (!%p1278_p2), %s1274_s15, 1024, %s1276_s17, %s1282_s20, %s1410_s11, %s1410_s11, %s1409_s26  }
  0x4a   : > { %p1411_p1 = scmp.ne.s32.totalorder %s1405_s29, 0 }
  0x4b   : > { %s1309_s12 = sand.u32 (!%p1411_p1), 1, %s1118_s22   ;;  %p1412_p4 = scmp.ne.s32.totalorder (!%p1411_p1), %s1403_s27, 0 }
  0x4c   : > { %274 = sbr.rel (%p1411_p1) target bundleno = 537 (0x219), region = 44  ;;  %s817_s13 = sshll.u32 (!%p1411_p1), %s1309_s12, 6 }
  0x4d   : > { %s277_s9 = scalar_lea.sflag (!%p1411_p1), [#allocation3], %s1309_s12  ;;  %s1313_s14 = scalar_lea.vmem (!%p1411_p1), [#allocation2], %s817_s13 }
  0x51   : > { %1101 = dma.done.wait (%p1412_p4), %s277_s9, 1024  }
  0x52   : > { %1103 = vsyncadd (%p1412_p4), %s277_s9, 4294966272  ;;  %p1413_p6 = scmp.eq.s32.totalorder %s1194_s25, 0 }
  0x54   : > { %1105 = dma.done.wait (%p1413_p6), [#allocation6], 768   ;;  %p1414_p8 = pmov %p1413_p6 }
  0x55   : > { %p325_p5 = scmp.lt.s32.totalorder %s1194_s25, 1  ;;  %v1133_v0 = vmov 0.0   ;;  %vm1134_vm0 = vmmov 0   ;;  %v1135_v1 = vmov 0   ;;  %v335_v2 = vld [vmem:[#allocation5 + $0x8] sm:$0xff]  ;;  %v334_v3 = vld [vmem:[#allocation5] sm:$0xff]  ;;  %v429_v12 = vlaneseq }
  0x56   : > { %1107 = vsyncadd (%p1414_p8), [#allocation6], 4294966528  ;;  %853 = vmatprep.subr.mxu0 %v1133_v0  ;;  %857 = vmatprep.mubr.msk.f32.mxu0 %vm1134_vm0, %v1133_v0  ;;  %vm343_vm1 = vcmask 130048   ;;  %v533_v6 = vld [vmem:[#allocation7 + $0x18] sm:$0xff]  ;;  %v532_v7 = vld [vmem:[#allocation7 + $0x10] sm:$0xff]  ;;  %vm534_vm2 = vcmask 261120  }
  0x57   : > { %s326_s29 = scalar_select %p325_p5, %s1194_s25, 1  ;;  %961 = vset.pattern.permute.xlu0 %v1135_v1  ;;  %854 = vmatpush3.msra.mxu0 %v335_v2  ;;  %v531_v8 = vld [vmem:[#allocation7 + $0x8] sm:$0xff]  ;;  %v530_v9 = vld [vmem:[#allocation7] sm:$0xff]  ;;  %v1136_v10 = vmov 1966171168   ;;  %v430_v14 = vshrl.u32 %v429_v12, 7 }
  0x58   : > { %855 = vmatprep.subr.mxu0 %v1133_v0  ;;  %880 = vmatprep.subr.mxu1 %v533_v6  ;;  %v427_v11 = vunpack.c.l.s4 %v1136_v10  ;;  %v823_v15 = vld [vmem:[%s1394_s4] ss:$0 sm:$0xff]  ;;  %v475_v33 = vld [vmem:[%s1313_s14 + $0x8] sm:$0xff]  ;;  %v476_v38 = vld [vmem:[%s1313_s14 + $0x10] sm:$0xff]  ;;  %s820_s11 = sshll.u32 %s1309_s12, 3  ;;  %s834_s13 = sshll.u32 %s1194_s25, 7 }
  0x59   : > { %s821_s15 = sshll.u32 %s326_s29, 3  ;;  %856 = vmatpush3.msra.mxu0 %v334_v3  ;;  %884 = vmatpush3.msra.mxu1 %v533_v6  ;;  %v484_v22 = vsub.s32 0, %v430_v14  ;;  %v474_v32 = vld [vmem:[%s1313_s14] sm:$0xff]  ;;  %v477_v43 = vld [vmem:[%s1313_s14 + $0x18] sm:$0xff]  ;;  %v479_v52 = vld [vmem:[%s1313_s14 + $0x28] sm:$0xff]  ;;  %s324_s9 = scalar_lea.vmem [#allocation8], %s820_s11 }
  0x5a   : > { %s328_s18 = scalar_lea.vmem %s1390_s0, %s821_s15  ;;  %s332_s8 = scalar_lea.vmem %s1392_s2, %s821_s15  ;;  %860 = vmatprep.subr.mxu0 %v533_v6  ;;  %881 = vmatprep.subr.mxu1 %v532_v7  ;;  %v428_v13 = vunpack.c.0.s8 %v427_v11  ;;  %v478_v46 = vld [vmem:[%s1313_s14 + $0x20] sm:$0xff]  ;;  %v480_v54 = vld [vmem:[%s1313_s14 + $0x30] sm:$0xff]  ;;  %v481_v58 = vld [vmem:[%s1313_s14 + $0x38] sm:$0xff] }
  0x5b   : > { %v333_v4 = vld [vmem:[%s328_s18] sm:$0xff]  ;;  %885 = vmatpush3.msra.mxu1 %v532_v7  ;;  %s695_s14 = sshll.u32 %s324_s9, 4  ;;  %s693_s17 = scalar_lea.hbm %s1396_s6, %s834_s13  ;;  %s696_s14 = int_to_ptr.vmem [resolvable:$true] %s695_s14 }
  0x5c   : > { %v417_v5 = vld [vmem:[%s332_s8] sm:$0xff]  ;;  %858 = vmatmul.mubr.msk.f32.vlgmr.msra.gmra.mxu0 %vm343_vm1, %v333_v4  ;;  %882 = vmatprep.subr.mxu1 %v531_v8  ;;  %v431_v19 = vsub.s32 %v428_v13, %v430_v14  ;;  %s682_s27 = scalar_lea.sflag [#allocation4], %s1309_s12  ;;  %s1058_s18 = scalar_lea.vmem %s696_s14, 128 }
  0x5d   : > { %420 = vperm.xlu0 %961, %v417_v5   ;;  %861 = vmatpush3.msra.mxu0 %v533_v6  ;;  %p1059_p2 = scmp.ne.s32.totalorder %s696_s14, %s1058_s18  ;;  %p1415_p7 = scmp.ne.s32.totalorder %s1407_s30, 0 }
  0x5e   : > { %862 = vmatprep.subr.mxu0 %v532_v7  ;;  %886 = vmatpush3.msra.mxu1 %v531_v8  ;;  %s1137_s20 = smov [#allocation8]  }
  0x5f   : > { %863 = vmatpush3.msra.mxu0 %v532_v7  ;;  %883 = vmatprep.subr.mxu1 %v530_v9  ;;  %p1060_p12 = pnand %p1059_p2, %p1415_p7  ;;  %s1062_s16 = sshll.u32 %s1137_s20, 4  ;;  %s1063_s16 = int_to_ptr.vmem [resolvable:$false] %s1062_s16 }
  0x60   : > { %864 = vmatprep.subr.mxu0 %v531_v8  ;;  %887 = vmatpush3.msra.mxu1 %v530_v9  ;;  %s1064_s25 = scalar_lea.vmem %s1063_s16, 256  ;;  %p1065_p0 = scmp.lt.s32.totalorder %s696_s14, %s1063_s16 }
  0x61   : > { %865 = vmatpush3.msra.mxu0 %v531_v8  ;;  %p1061_p13 = pneg %p1060_p12  ;;  %p1066_p10 = scmp.lt.s32.totalorder %s1064_s25, %s1058_s18 }
  0x62   : > { %866 = vmatprep.subr.mxu0 %v530_v9 }
  0x63   : > { %867 = vmatpush3.msra.mxu0 %v530_v9  ;;  %p1067_p3 = por %p1066_p10, %p1065_p0 }
  0x65   : > { %p1068_p11 = pnand %p1067_p3, %p1061_p13 }
  0xd8   : > { %v1334_v17 = vpop.permute.xlu0 %420 }
 0x11c   : > { %v413_v16 = vpop.f32.mrf.mxu0 }
 0x11d   : > { %v414_v18 = vadd.f32 %v823_v15, %v413_v16 }
 0x11e   : > { %v859_v20 = vpop.f32.mrf.mxu0 }
 0x11f   : > { %v423_v21 = vmul.f32 %v1334_v17, %v414_v18 }
 0x121   : > { %v425_v23 = vcombine.high %v423_v21, %v423_v21  ;;  %v432_v24 = vrot.slane %v423_v21, %v431_v19 }
 0x123   : > { %v439_v25 = vrot.slane %v425_v23, %v431_v19  ;;  %v440_v26 = vcombine.high %v432_v24, %v432_v24  ;;  %v448_v27 = vrot.slane %v432_v24, %v431_v19 }
 0x125   : > { %v441_v28 = vcombine.high %v439_v25, %v439_v25  ;;  %v455_v29 = vrot.slane %v439_v25, %v431_v19  ;;  %v462_v30 = vrot.slane %v440_v26, %v431_v19  ;;  %v485_v31 = vrot.slane %v448_v27, %v484_v22 }
 0x126   : > { %v470_v34 = vcombine.high %v448_v27, %v448_v27 }
 0x127   : > { %v469_v35 = vrot.slane %v441_v28, %v431_v19  ;;  %v472_v36 = vcombine.high %v462_v30, %v462_v30  ;;  %v489_v37 = vrot.slane %v462_v30, %v484_v22  ;;  %v471_v39 = vcombine.high %v455_v29, %v455_v29 }
 0x128   : > { %v501_v40 = vrot.slane %v455_v29, %v484_v22  ;;  %v522_v41 = vmul.f32 %v485_v31, %v474_v32  ;;  %v493_v42 = vrot.slane %v470_v34, %v484_v22 }
 0x129   : > { %v523_v44 = vmul.f32 %v489_v37, %v475_v33  ;;  %v497_v45 = vrot.slane %v472_v36, %v484_v22  ;;  %v473_v48 = vcombine.high %v469_v35, %v469_v35  ;;  %v505_v50 = vrot.slane %v469_v35, %v484_v22 }
 0x12a   : > { %868 = vmatprep.mubr.msk.f32.mxu0 %vm534_vm2, %v522_v41  ;;  %v524_v47 = vmul.f32 %v493_v42, %v476_v38  ;;  %v526_v51 = vmul.f32 %v501_v40, %v478_v46  ;;  %v509_v53 = vrot.slane %v471_v39, %v484_v22 }
 0x12b   : > { %869 = vmatmul.mubr.msk.f32.vlgmr.msra.gmra.mxu0 %vm534_vm2, %v523_v44  ;;  %v525_v49 = vmul.f32 %v497_v45, %v477_v43  ;;  %v527_v55 = vmul.f32 %v505_v50, %v479_v52  ;;  %v513_v56 = vrot.slane %v473_v48, %v484_v22 }
 0x12c   : > { %871 = vmatprep.mubr.msk.f32.mxu1 %vm534_vm2, %v524_v47  ;;  %v528_v57 = vmul.f32 %v509_v53, %v480_v54 }
 0x12d   : > { %872 = vmatmul.mubr.msk.f32.vlgmr.msra.gmra.mxu1 %vm534_vm2, %v525_v49  ;;  %v529_v59 = vmul.f32 %v513_v56, %v481_v58 }
 0x12e   : > { %874 = vmatprep.mubr.msk.f32.mxu1 %vm534_vm2, %v526_v51 }
 0x131   : > { %875 = vmatmul.mubr.msk.f32.gmra.mxu1 %vm534_vm2, %v527_v55 }
 0x132   : > { %877 = vmatprep.mubr.msk.f32.mxu1 %vm534_vm2, %v528_v57 }
 0x135   : > { %878 = vmatmul.mubr.msk.f32.gmra.mxu1 %vm534_vm2, %v529_v59 }
 0x1eb   : > { %v870_v60 = vpop.f32.mrf.mxu0 }
 0x1ec   : > { %962 = vtanh.f32 %v870_v60 }
 0x1ed   : > { %v625_v61 = vpop.f32.mrf.mxu0  ;;  %v873_v62 = vpop.f32.mrf.mxu1 }
 0x1ee   : > { %964 = vtanh.f32 %v625_v61 }
 0x1ef   : > { %v635_v63 = vpop.f32.mrf.mxu1 }
 0x1f0   : > { %966 = vtanh.f32 %v635_v63 }
 0x1f1   : > { %v876_v0 = vpop.f32.mrf.mxu1  ;;  %968 = vtanh.f32 %v873_v62 }
 0x1f3   : > { %v645_v1 = vpop.f32.mrf.mxu1 }
 0x1f4   : > { %970 = vtanh.f32 %v645_v1 }
 0x1f5   : > { %v879_v2 = vpop.f32.mrf.mxu1  ;;  %972 = vtanh.f32 %v876_v0 }
 0x1f7   : > { %v655_v3 = vpop.f32.mrf.mxu1 }
 0x1f8   : > { %974 = vtanh.f32 %v655_v3 }
 0x1f9   : > { %v963_v4 = vpop.eup %962  ;;  %976 = vtanh.f32 %v879_v2 }
 0x1fb   : > { %v965_v5 = vpop.eup %964 }
 0x1fc   : > { %v672_v6 = vadd.f32 %v965_v5, %v963_v4 }
 0x1fd   : > { %v967_v7 = vpop.eup %966 }
 0x1fe   : > { %v673_v8 = vadd.f32 %v967_v7, %v672_v6  ;;  %v969_v9 = vpop.eup %968 }
 0x200   : > { %v674_v10 = vadd.f32 %v969_v9, %v673_v8 }
 0x201   : > { %v971_v11 = vpop.eup %970 }
 0x202   : > { %v675_v12 = vadd.f32 %v971_v11, %v674_v10  ;;  %v973_v13 = vpop.eup %972 }
 0x204   : > { %v676_v14 = vadd.f32 %v973_v13, %v675_v12 }
 0x205   : > { %v975_v15 = vpop.eup %974 }
 0x206   : > { %v677_v16 = vadd.f32 %v975_v15, %v676_v14  ;;  %v977_v18 = vpop.eup %976 }
 0x208   : > { %v678_v19 = vadd.f32 %v977_v18, %v677_v16 }
 0x20a   : > { %v679_v20 = vmul.f32 %v678_v19, %v1334_v17 }
 0x20c   : > { %680 = vst [vmem:[%s324_s9] sm:$0xff] %v679_v20 }
 0x20d   : > { %1071 = shalt.err (!%p1068_p11)
}
 0x20e   : > { %s1072_s8 = scalar_lea.hbm %s693_s17, 128  ;;  %s1076_s26 = scalar_lea.hbm %s1396_s6, 256 }
 0x20f   : > { %p1073_p9 = scmp.ne.s32.totalorder %s693_s17, %s1072_s8  ;;  %p1077_p6 = scmp.lt.s32.totalorder %s693_s17, %s1396_s6 }
 0x210   : > { %p1078_p8 = scmp.lt.s32.totalorder %s1076_s26, %s1072_s8 }
 0x211   : > { %p1074_p1 = pnand %p1073_p9, %p1415_p7 }
 0x212   : > { %p1079_p5 = por %p1078_p8, %p1077_p6 }
 0x213   : > { %p1075_p4 = pneg %p1074_p1 }
 0x215   : > { %p1080_p2 = pnand %p1079_p5, %p1075_p4 }
 0x217   : > { %1083 = shalt.err (!%p1080_p2)
}
 0x218   : > { %898 = dma.vmem_to_hbm [thread:$0]  (%p1415_p7), %s696_s14, 128, %s693_s17, %s682_s27  }
 0x219 PF: > { %s707_s9 = sand.u32 1, %s1114_s21   ;;  %p1416_p12 = scmp.ne.s32.totalorder %s1404_s28, 0 }
 0x21a   : > { %p1417_p13 = scmp.ge.s32.totalorder %s1126_s24, 2  ;;  %s708_s29 = scalar_lea.sflag [#allocation4], %s707_s9 }
 0x21c   : > { %p912_p0 = pnand %p1417_p13, %p1416_p12 }
 0x21e   : > { %p913_p10 = pneg %p912_p0 }
 0x220   : > { %1109 = dma.done.wait (%p913_p10), %s708_s29, 128  }
 0x221   : > { %1111 = vsyncadd (%p913_p10), %s708_s29, 4294967168  ;;  %p20_p3 = scmp.ge.s32.totalorder %s1251_s19, 4   ;;  %s1418_s21 = smov %s1118_s22 }
 0x222   : > { %s1419_s22 = smov %s1122_s23  ;;  %s1420_s23 = smov %s1267_s7 }
 0x223   : > { %s1421_s24 = smov %s1251_s19  ;;  %22 = sbr.rel (!%p20_p3) target bundleno = 6 (0x6), region = 103 }
 0x228   :  { %713 = vsyncpa [#allocation3], 1 }
 0x229   :  { %715 = vsyncpa [#allocation3 + $0x1], 1 }
 0x22a   :  { %716 = vsyncpa [#allocation6], 1 }
 0x22b   :  { %717 = vsyncpa [#allocation4], 1 }
 0x22c   :  { %719 = vsyncpa [#allocation4 + $0x1], 1 }

</bundles_post_ra>
